<compile_context>
chip_gen: v7x
topology: tpu7x:2x2x1
jax: 0.10.0
libtpu: 0.0.40
codegen_flags: <defaults>
</compile_context>

<pallas_src>
import functools

import jax
import jax.numpy as jnp
from jax.experimental import pallas as pl
from jax.experimental.pallas import tpu as pltpu


def _context_fold_kernel(x_ref, wkv_ref, wq_ref, wout_ref, mask_ref, w3_ref,
                         m_scr, d_scr, ctx_scr, *, heads, dim_head):
    """Phase 1: per (batch, n-tile) reduction into the folded (c, c) weight.

    x_ref   : (c, tn)          bf16 input pixels, channels-first (lane-dense n)
    wkv_ref : (c, 2*hidden)    [k | v] 1x1-conv weight, bf16
    wq_ref  : (c, hidden)      q 1x1-conv weight, bf16 (only used in the fold)
    wout_ref: (c, hidden)      output 1x1-conv weight, bf16
    mask_ref: (hidden, hidden) same-head block-diagonal mask, f32 (constant)
    w3_ref  : (c, c)           folded weight output (written at last tile)
    scratch : running softmax max / denom (1, hidden) and transposed context
              ctx_t[e, d] (hidden, hidden), all f32.
    """
    hidden = heads * dim_head
    i = pl.program_id(1)
    nt = pl.num_programs(1)

    @pl.when(i == 0)
    def _init():
        m_scr[...] = jnp.full_like(m_scr, -jnp.inf)
        d_scr[...] = jnp.zeros_like(d_scr)
        ctx_scr[...] = jnp.zeros_like(ctx_scr)

    x_bf = x_ref[...]                                              # (c, tn) bf16

    # k/v projection: 1x1 conv == contraction over channels. 256-wide MXU N
    # (do NOT split into two 128-wide projections).
    kv = jax.lax.dot_general(
        x_bf, wkv_ref[...], (((0,), (0,)), ((), ())),
        preferred_element_type=jnp.float32)                        # (tn, 2*hidden) f32
    k = kv[:, :hidden]
    v = kv[:, hidden:]

    # Online softmax over the (tiled) sequence axis; stats stay in f32.
    m_prev = m_scr[...]                                            # (1, hidden)
    m_new = jnp.maximum(m_prev, jnp.max(k, axis=0, keepdims=True))
    alpha = jnp.exp(m_prev - m_new)                                # rescale old stats
    k_exp = jnp.exp(k - m_new)                                     # (tn, hidden), unnormalized
    d_scr[...] = alpha * d_scr[...] + jnp.sum(k_exp, axis=0, keepdims=True)

    # Unnormalized transposed context: ctx_t[e, d] = sum_n v[n, e] * k_exp[n, d].
    # Keeping d on the lane axis lets the (1, hidden) stats broadcast for free.
    ctx_tile = jax.lax.dot_general(
        v.astype(jnp.bfloat16), k_exp.astype(jnp.bfloat16),
        (((0,), (0,)), ((), ())),
        preferred_element_type=jnp.float32)                        # (hidden, hidden)
    ctx_scr[...] = alpha * ctx_scr[...] + ctx_tile
    m_scr[...] = m_new

    @pl.when(i == nt - 1)
    def _fold():
        # Deferred softmax normalization: one exact divide over (1, hidden),
        # applied to the tiny context (not the (n, hidden) slab), plus the
        # precomputed same-head block-diagonal mask.
        ctx = ctx_scr[...] * (1.0 / d_scr[...]) * mask_ref[...]    # (hidden, hidden) f32
        # Fold the output projection: W2[o, d] = sum_e wout[o, e] * ctx_t[e, d].
        w2 = jnp.dot(wout_ref[...], ctx.astype(jnp.bfloat16),
                     preferred_element_type=jnp.float32)           # (c, hidden)
        # Fold the q projection:      W3[o, ci] = sum_d W2[o, d] * wq[ci, d].
        w3_ref[...] = jax.lax.dot_general(
            w2.astype(jnp.bfloat16), wq_ref[...],
            (((1,), (1,)), ((), ())),
            preferred_element_type=jnp.float32)                    # (c, c)


def _apply_kernel(x_ref, w3_ref, bout_ref, o_ref):
    """Phase 2 (fully parallel): out[:, tile] = W3 @ x[:, tile] + bias."""
    out = jnp.dot(w3_ref[...].astype(jnp.bfloat16), x_ref[...],
                  preferred_element_type=jnp.float32)              # (c, tn) f32
    o_ref[...] = (out + bout_ref[...]).astype(o_ref.dtype)


def _pick_seq_tile(n):
    # Prefer large, 128-multiple tiles (lane-dense stores, amortized per-step
    # overhead) while bounding per-step VMEM for v7x's 64 MiB budget.
    for t in (1024, 512, 256, 128):
        if n % t == 0:
            return t
    return n  # fallback: whole-sequence block (correct; stores may be masked)


def _const_spec(shape):
    # Constant-index weight/bias/mask blocks: single-buffered (no need for the
    # second pipeline buffer since the block never changes).
    return pl.BlockSpec(shape, lambda bi, i: tuple(0 for _ in shape),
                        pipeline_mode=pl.Buffered(1))


def linear_attention(x_nchw, w_qkv, w_out, b_out, *, heads, dim_head):
    """x_nchw: (b, c, h, w). w_qkv: (3*hidden, c, 1, 1). w_out: (c, hidden, 1, 1)."""
    b, c, h, w = x_nchw.shape
    n = h * w
    hidden = heads * dim_head
    assert w_qkv.shape == (3 * hidden, c, 1, 1)
    assert w_out.shape == (c, hidden, 1, 1)

    tn = _pick_seq_tile(n)
    nt = n // tn

    # Weights are tiny; one-time reshape/transpose/cast is negligible.
    # Conv output channel order is (qkv, heads, dim_head): rows 0:H are q,
    # H:2H are k, 2H:3H are v.
    wqkv2 = w_qkv.reshape(3 * hidden, c)
    wq_t = jnp.transpose(wqkv2[:hidden, :]).astype(jnp.bfloat16)          # (c, hidden)
    wkv_t = jnp.transpose(wqkv2[hidden:, :]).astype(jnp.bfloat16)         # (c, 2*hidden)
    wout = w_out.reshape(c, hidden).astype(jnp.bfloat16)                  # (c, hidden)
    bout = b_out.reshape(c, 1).astype(jnp.float32)                        # (c, 1)

    # Precomputed same-head block-diagonal mask (symmetric, so it works for
    # the transposed context as well).
    head_id = jnp.arange(hidden, dtype=jnp.int32) // dim_head
    mask = (head_id[:, None] == head_id[None, :]).astype(jnp.float32)     # (hidden, hidden)

    # Activations: reshape only (no HBM transpose) + one bf16 cast so the
    # per-step x DMA is half-width.
    x_bcn = x_nchw.reshape(b, c, n).astype(jnp.bfloat16)                  # (b, c, n) bf16

    # ---- Phase 1: reduce over n tiles into the folded per-batch (c, c) weight.
    w3 = pl.pallas_call(
        functools.partial(_context_fold_kernel, heads=heads, dim_head=dim_head),
        out_shape=jax.ShapeDtypeStruct((b, c, c), jnp.float32),
        grid_spec=pltpu.PrefetchScalarGridSpec(
            num_scalar_prefetch=0,
            grid=(b, nt),
            in_specs=[
                pl.BlockSpec((None, c, tn), lambda bi, i: (bi, 0, i)),
                _const_spec((c, 2 * hidden)),     # wkv
                _const_spec((c, hidden)),         # wq
                _const_spec((c, hidden)),         # wout
                _const_spec((hidden, hidden)),    # head mask
            ],
            out_specs=pl.BlockSpec((None, c, c), lambda bi, i: (bi, 0, 0)),
            scratch_shapes=[
                pltpu.VMEM((1, hidden), jnp.float32),        # running max
                pltpu.VMEM((1, hidden), jnp.float32),        # running denom
                pltpu.VMEM((hidden, hidden), jnp.float32),   # running ctx_t
            ],
        ),
        compiler_params=pltpu.CompilerParams(
            dimension_semantics=("parallel", "arbitrary"),
            vmem_limit_bytes=48 * 1024 * 1024),
    )(x_bcn, wkv_t, wq_t, wout, mask)

    # ---- Phase 2: fully parallel (batch and tile) epilogue, lane-dense stores.
    out_bcn = pl.pallas_call(
        _apply_kernel,
        out_shape=jax.ShapeDtypeStruct((b, c, n), x_nchw.dtype),
        grid_spec=pltpu.PrefetchScalarGridSpec(
            num_scalar_prefetch=0,
            grid=(b, nt),
            in_specs=[
                pl.BlockSpec((None, c, tn), lambda bi, i: (bi, 0, i)),
                pl.BlockSpec((None, c, c), lambda bi, i: (bi, 0, 0)),
                _const_spec((c, 1)),              # output bias
            ],
            out_specs=pl.BlockSpec((None, c, tn), lambda bi, i: (bi, 0, i)),
        ),
        compiler_params=pltpu.CompilerParams(
            dimension_semantics=("parallel", "parallel"),
            vmem_limit_bytes=48 * 1024 * 1024),
    )(x_bcn, w3, bout)

    # back to NCHW: reshape only, no transpose
    return out_bcn.reshape(b, c, h, w)


def _reference(x, w_qkv, w_out, b_out, *, heads, dim_head):
    """Pure-JAX (f32) re-implementation of the torch module, for verification."""
    b, c, h, w = x.shape
    hidden = heads * dim_head
    n = h * w
    qkv = jnp.einsum('bchw,oc->bohw', x, w_qkv.reshape(3 * hidden, c))
    qkv = qkv.reshape(b, 3, heads, dim_head, n)
    q, k, v = qkv[:, 0], qkv[:, 1], qkv[:, 2]
    k = jax.nn.softmax(k, axis=-1)
    context = jnp.einsum('bhdn,bhen->bhde', k, v)
    out = jnp.einsum('bhde,bhdn->bhen', context, q)
    out = out.reshape(b, hidden, h, w)
    out = (jnp.einsum('bchw,oc->bohw', out, w_out.reshape(c, hidden))
           + b_out[None, :, None, None])
    return out


if __name__ == "__main__":
    # small shapes consistent with the module (heads=4, dim_head=32 -> hidden=128)
    B, DIM, H, W = 2, 8, 16, 16
    HEADS, DIM_HEAD = 4, 32
    HIDDEN = HEADS * DIM_HEAD

    key = jax.random.PRNGKey(0)
    kx, kq, kw, kb = jax.random.split(key, 4)

    x = jax.random.normal(kx, (B, DIM, H, W), dtype=jnp.float32)
    # deterministic synthetic parameters (shapes from nn.Conv2d in __init__)
    w_qkv = jax.random.normal(kq, (3 * HIDDEN, DIM, 1, 1), dtype=jnp.float32) * 0.05
    w_out = jax.random.normal(kw, (DIM, HIDDEN, 1, 1), dtype=jnp.float32) * 0.05
    b_out = jax.random.normal(kb, (DIM,), dtype=jnp.float32) * 0.05

    out = linear_attention(x, w_qkv, w_out, b_out, heads=HEADS, dim_head=DIM_HEAD)
    out = jax.block_until_ready(out)

    ref = _reference(x, w_qkv, w_out, b_out, heads=HEADS, dim_head=DIM_HEAD)
    assert out.shape == (B, DIM, H, W)
    # bf16 MXU operands (f32 accumulation, exact softmax divide) -> bf16 tolerance.
    assert jnp.allclose(out, ref, atol=5e-3, rtol=5e-3), "mismatch vs reference"

    print("KERNEL_OK")
</pallas_src>

<mosaic_0001>
module attributes {stable_mosaic.version = 11 : i64} {
  func.func @_context_fold_kernel(%arg0: i32, %arg1: i32, %arg2: memref<1x8x256xbf16, #tpu.memory_space<vmem>>, %arg3: memref<8x256xbf16, #tpu.memory_space<vmem>>, %arg4: memref<8x128xbf16, #tpu.memory_space<vmem>>, %arg5: memref<8x128xbf16, #tpu.memory_space<vmem>>, %arg6: memref<128x128xf32, #tpu.memory_space<vmem>>, %arg7: memref<1x8x8xf32, #tpu.memory_space<vmem>>, %arg8: memref<1x128xf32, #tpu.memory_space<vmem>>, %arg9: memref<1x128xf32, #tpu.memory_space<vmem>>, %arg10: memref<128x128xf32, #tpu.memory_space<vmem>>) attributes {dimension_semantics = [#tpu.dimension_semantics<parallel>, #tpu.dimension_semantics<arbitrary>], iteration_bounds = array<i64: 2, 1>, scalar_prefetch = 0 : i64, scratch_operands = 3 : i64, tpu.core_type = #tpu.core_type<tc>, window_params = [{transform_indices = @transform_0, window_bounds = array<i64: 1, 8, 256>}, {pipeline_mode = #tpu.pipeline_mode<synchronous>, transform_indices = @transform_1, window_bounds = array<i64: 8, 256>}, {pipeline_mode = #tpu.pipeline_mode<synchronous>, transform_indices = @transform_2, window_bounds = array<i64: 8, 128>}, {pipeline_mode = #tpu.pipeline_mode<synchronous>, transform_indices = @transform_3, window_bounds = array<i64: 8, 128>}, {pipeline_mode = #tpu.pipeline_mode<synchronous>, transform_indices = @transform_4, window_bounds = array<i64: 128, 128>}, {transform_indices = @transform_5, window_bounds = array<i64: 1, 8, 8>}]} {
    %c0_i32 = arith.constant 0 : i32
    %0 = arith.cmpi eq, %arg1, %c0_i32 : i32
    %1 = arith.extui %0 : i1 to i32
    %c0_i32_0 = arith.constant 0 : i32
    %2 = arith.cmpi ne, %1, %c0_i32_0 : i32
    scf.if %2 {
      %cst_22 = arith.constant 0xFF800000 : f32
      %36 = vector.broadcast %cst_22 : f32 to vector<1x128xf32>
      %c0_23 = arith.constant 0 : index
      %c0_24 = arith.constant 0 : index
      %37 = vector.load %arg8[%c0_23, %c0_24] : memref<1x128xf32, #tpu.memory_space<vmem>>, vector<1x128xf32>
      tpu.vector_store %arg8[%c0_23, %c0_24], %36 {strides = array<i32>} : memref<1x128xf32, #tpu.memory_space<vmem>>, vector<1x128xf32>,
      %cst_25 = arith.constant 0.000000e+00 : f32
      %38 = vector.broadcast %cst_25 : f32 to vector<1x128xf32>
      %c0_26 = arith.constant 0 : index
      %c0_27 = arith.constant 0 : index
      %39 = vector.load %arg9[%c0_26, %c0_27] : memref<1x128xf32, #tpu.memory_space<vmem>>, vector<1x128xf32>
      tpu.vector_store %arg9[%c0_26, %c0_27], %38 {strides = array<i32>} : memref<1x128xf32, #tpu.memory_space<vmem>>, vector<1x128xf32>,
      %cst_28 = arith.constant 0.000000e+00 : f32
      %40 = vector.broadcast %cst_28 : f32 to vector<128x128xf32>
      %c0_29 = arith.constant 0 : index
      %c0_30 = arith.constant 0 : index
      %41 = vector.load %arg10[%c0_29, %c0_30] : memref<128x128xf32, #tpu.memory_space<vmem>>, vector<128x128xf32>
      tpu.vector_store %arg10[%c0_29, %c0_30], %40 {strides = array<i32>} : memref<128x128xf32, #tpu.memory_space<vmem>>, vector<128x128xf32>,
    } else {
    }
    %c0 = arith.constant 0 : index
    %c0_1 = arith.constant 0 : index
    %c0_2 = arith.constant 0 : index
    %3 = vector.load %arg2[%c0, %c0_1, %c0_2] : memref<1x8x256xbf16, #tpu.memory_space<vmem>>, vector<1x8x256xbf16>
    %4 = vector.shape_cast %3 : vector<1x8x256xbf16> to vector<8x256xbf16>
    %c0_3 = arith.constant 0 : index
    %c0_4 = arith.constant 0 : index
    %5 = vector.load %arg3[%c0_3, %c0_4] : memref<8x256xbf16, #tpu.memory_space<vmem>>, vector<8x256xbf16>
    %cst = arith.constant dense<0.000000e+00> : vector<256x256xf32>
    %6 = tpu.matmul %4, %5, %cst {dimension_numbers = #tpu.dot_dimension_numbers<[0], [0], [1], [1], [0, 1, 1, 1], [], []>} : vector<8x256xbf16>, vector<8x256xbf16>, vector<256x256xf32> -> vector<256x256xf32>
    %7 = vector.extract_strided_slice %6 {offsets = [0, 0], sizes = [256, 128], strides = [1, 1]} : vector<256x256xf32> to vector<256x128xf32>
    %8 = vector.extract_strided_slice %6 {offsets = [0, 128], sizes = [256, 128], strides = [1, 1]} : vector<256x256xf32> to vector<256x128xf32>
    %c0_5 = arith.constant 0 : index
    %c0_6 = arith.constant 0 : index
    %9 = vector.load %arg8[%c0_5, %c0_6] : memref<1x128xf32, #tpu.memory_space<vmem>>, vector<1x128xf32>
    %cst_7 = arith.constant dense<0xFF800000> : vector<128xf32>
    %10 = vector.multi_reduction <maximumf>, %7, %cst_7 [0] : vector<256x128xf32> to vector<128xf32>
    %11 = vector.shape_cast %10 : vector<128xf32> to vector<1x128xf32>
    %12 = arith.maximumf %9, %11 : vector<1x128xf32>
    %13 = arith.subf %9, %12 : vector<1x128xf32>
    %14 = math.exp %13 : vector<1x128xf32>
    %15 = vector.broadcast %12 : vector<1x128xf32> to vector<256x128xf32>
    %16 = arith.subf %7, %15 : vector<256x128xf32>
    %17 = math.exp %16 : vector<256x128xf32>
    %c0_8 = arith.constant 0 : index
    %c0_9 = arith.constant 0 : index
    %18 = vector.load %arg9[%c0_8, %c0_9] : memref<1x128xf32, #tpu.memory_space<vmem>>, vector<1x128xf32>
    %19 = arith.mulf %14, %18 : vector<1x128xf32>
    %cst_10 = arith.constant dense<0.000000e+00> : vector<128xf32>
    %20 = vector.multi_reduction <add>, %17, %cst_10 [0] : vector<256x128xf32> to vector<128xf32>
    %21 = vector.shape_cast %20 : vector<128xf32> to vector<1x128xf32>
    %22 = arith.addf %19, %21 : vector<1x128xf32>
    %c0_11 = arith.constant 0 : index
    %c0_12 = arith.constant 0 : index
    %23 = vector.load %arg9[%c0_11, %c0_12] : memref<1x128xf32, #tpu.memory_space<vmem>>, vector<1x128xf32>
    tpu.vector_store %arg9[%c0_11, %c0_12], %22 {strides = array<i32>} : memref<1x128xf32, #tpu.memory_space<vmem>>, vector<1x128xf32>,
    %24 = arith.truncf %8 : vector<256x128xf32> to vector<256x128xbf16>
    %25 = arith.truncf %17 : vector<256x128xf32> to vector<256x128xbf16>
    %cst_13 = arith.constant dense<0.000000e+00> : vector<128x128xf32>
    %26 = tpu.matmul %24, %25, %cst_13 {dimension_numbers = #tpu.dot_dimension_numbers<[0], [0], [1], [1], [0, 1, 1, 1], [], []>} : vector<256x128xbf16>, vector<256x128xbf16>, vector<128x128xf32> -> vector<128x128xf32>
    %c0_14 = arith.constant 0 : index
    %c0_15 = arith.constant 0 : index
    %27 = vector.load %arg10[%c0_14, %c0_15] : memref<128x128xf32, #tpu.memory_space<vmem>>, vector<128x128xf32>
    %28 = vector.broadcast %14 : vector<1x128xf32> to vector<128x128xf32>
    %29 = arith.mulf %28, %27 : vector<128x128xf32>
    %30 = arith.addf %29, %26 : vector<128x128xf32>
    %c0_16 = arith.constant 0 : index
    %c0_17 = arith.constant 0 : index
    %31 = vector.load %arg10[%c0_16, %c0_17] : memref<128x128xf32, #tpu.memory_space<vmem>>, vector<128x128xf32>
    tpu.vector_store %arg10[%c0_16, %c0_17], %30 {strides = array<i32>} : memref<128x128xf32, #tpu.memory_space<vmem>>, vector<128x128xf32>,
    %c0_18 = arith.constant 0 : index
    %c0_19 = arith.constant 0 : index
    %32 = vector.load %arg8[%c0_18, %c0_19] : memref<1x128xf32, #tpu.memory_space<vmem>>, vector<1x128xf32>
    tpu.vector_store %arg8[%c0_18, %c0_19], %12 {strides = array<i32>} : memref<1x128xf32, #tpu.memory_space<vmem>>, vector<1x128xf32>,
    %c0_i32_20 = arith.constant 0 : i32
    %33 = arith.cmpi eq, %arg1, %c0_i32_20 : i32
    %34 = arith.extui %33 : i1 to i32
    %c0_i32_21 = arith.constant 0 : i32
    %35 = arith.cmpi ne, %34, %c0_i32_21 : i32
    scf.if %35 {
      %c0_22 = arith.constant 0 : index
      %c0_23 = arith.constant 0 : index
      %36 = vector.load %arg10[%c0_22, %c0_23] : memref<128x128xf32, #tpu.memory_space<vmem>>, vector<128x128xf32>
      %c0_24 = arith.constant 0 : index
      %c0_25 = arith.constant 0 : index
      %37 = vector.load %arg9[%c0_24, %c0_25] : memref<1x128xf32, #tpu.memory_space<vmem>>, vector<1x128xf32>
      %cst_26 = arith.constant 1.000000e+00 : f32
      %38 = vector.broadcast %cst_26 : f32 to vector<1x128xf32>
      %39 = arith.divf %38, %37 : vector<1x128xf32>
      %40 = vector.broadcast %39 : vector<1x128xf32> to vector<128x128xf32>
      %41 = arith.mulf %36, %40 : vector<128x128xf32>
      %c0_27 = arith.constant 0 : index
      %c0_28 = arith.constant 0 : index
      %42 = vector.load %arg6[%c0_27, %c0_28] : memref<128x128xf32, #tpu.memory_space<vmem>>, vector<128x128xf32>
      %43 = arith.mulf %41, %42 : vector<128x128xf32>
      %c0_29 = arith.constant 0 : index
      %c0_30 = arith.constant 0 : index
      %44 = vector.load %arg5[%c0_29, %c0_30] : memref<8x128xbf16, #tpu.memory_space<vmem>>, vector<8x128xbf16>
      %45 = arith.truncf %43 : vector<128x128xf32> to vector<128x128xbf16>
      %cst_31 = arith.constant dense<0.000000e+00> : vector<8x128xf32>
      %46 = tpu.matmul %44, %45, %cst_31 {dimension_numbers = #tpu.dot_dimension_numbers<[1], [0], [0], [1], [0, 0, 1, 1], [], []>} : vector<8x128xbf16>, vector<128x128xbf16>, vector<8x128xf32> -> vector<8x128xf32>
      %47 = arith.truncf %46 : vector<8x128xf32> to vector<8x128xbf16>
      %c0_32 = arith.constant 0 : index
      %c0_33 = arith.constant 0 : index
      %48 = vector.load %arg4[%c0_32, %c0_33] : memref<8x128xbf16, #tpu.memory_space<vmem>>, vector<8x128xbf16>
      %cst_34 = arith.constant dense<0.000000e+00> : vector<8x8xf32>
      %49 = tpu.matmul %47, %48, %cst_34 {dimension_numbers = #tpu.dot_dimension_numbers<[1], [1], [0], [0], [0, 0, 1, 0], [], []>} : vector<8x128xbf16>, vector<8x128xbf16>, vector<8x8xf32> -> vector<8x8xf32>
      %c0_35 = arith.constant 0 : index
      %c0_36 = arith.constant 0 : index
      %c0_37 = arith.constant 0 : index
      %50 = vector.load %arg7[%c0_35, %c0_36, %c0_37] : memref<1x8x8xf32, #tpu.memory_space<vmem>>, vector<1x8x8xf32>
      %51 = vector.shape_cast %50 : vector<1x8x8xf32> to vector<8x8xf32>
      %52 = vector.shape_cast %49 : vector<8x8xf32> to vector<1x8x8xf32>
      tpu.vector_store %arg7[%c0_35, %c0_36, %c0_37], %52 {strides = array<i32>} : memref<1x8x8xf32, #tpu.memory_space<vmem>>, vector<1x8x8xf32>,
    } else {
    }
    return
  }
  func.func @transform_0(%arg0: i32, %arg1: i32) -> (i32, i32, i32) {
    %c0_i32 = arith.constant 0 : i32
    %c0_i32_0 = arith.constant 0 : i32
    return %arg0, %c0_i32, %arg1 : i32, i32, i32
  }
  func.func @transform_1(%arg0: i32, %arg1: i32) -> (i32, i32) {
    %c0_i32 = arith.constant 0 : i32
    %c0_i32_0 = arith.constant 0 : i32
    %c0_i32_1 = arith.constant 0 : i32
    return %c0_i32, %c0_i32_0 : i32, i32
  }
  func.func @transform_2(%arg0: i32, %arg1: i32) -> (i32, i32) {
    %c0_i32 = arith.constant 0 : i32
    %c0_i32_0 = arith.constant 0 : i32
    %c0_i32_1 = arith.constant 0 : i32
    return %c0_i32, %c0_i32_0 : i32, i32
  }
  func.func @transform_3(%arg0: i32, %arg1: i32) -> (i32, i32) {
    %c0_i32 = arith.constant 0 : i32
    %c0_i32_0 = arith.constant 0 : i32
    %c0_i32_1 = arith.constant 0 : i32
    return %c0_i32, %c0_i32_0 : i32, i32
  }
  func.func @transform_4(%arg0: i32, %arg1: i32) -> (i32, i32) {
    %c0_i32 = arith.constant 0 : i32
    %c0_i32_0 = arith.constant 0 : i32
    %c0_i32_1 = arith.constant 0 : i32
    return %c0_i32, %c0_i32_0 : i32, i32
  }
  func.func @transform_5(%arg0: i32, %arg1: i32) -> (i32, i32, i32) {
    %c0_i32 = arith.constant 0 : i32
    %c0_i32_0 = arith.constant 0 : i32
    %c0_i32_1 = arith.constant 0 : i32
    return %arg0, %c0_i32, %c0_i32_0 : i32, i32, i32
  }
}

</mosaic_0001>

<bundles_post_ra>
// kernel: tpu_custom_call.1
= control target key start
LH: loop header
LB: loop body
LE: loop exit
PB: predicated region body
PF: predicated region fallthrough
CT: control target
= control target key end

     0   :  { %10 = vsyncpa [#allocation6], 0  ;;  %s2510_s0 = inlined_call_operand.hbm [shape: bf16[2,8,256], index: 0, kind: input, shape index: {}]   ;;  %s2511_s1 = inlined_call_operand.hbm [shape: bf16[8,256], index: 1, kind: input, shape index: {}]   ;;  %s2512_s2 = inlined_call_operand.vmem [shape: bf16[8,128], index: 2, kind: input, shape index: {}]   ;;  %s2513_s3 = inlined_call_operand.vmem [shape: bf16[8,128], index: 3, kind: input, shape index: {}]   ;;  %s2514_s4 = inlined_call_operand.hbm [shape: f32[128,128], index: 4, kind: input, shape index: {}]   ;;  %s2515_s5 = inlined_call_operand.hbm [shape: f32[2,8,8], index: 5, kind: output, shape index: {}]  }
   0x1   :  { %12 = vsyncpa [#allocation6 + $0x1], 0 }
   0x2   :  { %13 = vsyncpa [#allocation9], 0 }
   0x3   :  { %14 = vsyncpa [#allocation7], 0 }
   0x4   :  { %16 = vsyncpa [#allocation7 + $0x1], 0  ;;  %s1818_s18 = smov 0   ;;  %s1820_s19 = smov 0  }
   0x5   :  { %s1822_s20 = smov 0   ;;  %s1824_s21 = smov 0  }
   0x6   :  { %s1826_s22 = smov 0   ;;  %s1828_s23 = smov 0  }
   0x7 LB: > { %s1302_s24 = sadd.s32 4294967295, %s1776_s23   ;;  %s1303_s25 = sadd.s32 4294967294, %s1776_s23   ;;  %s1776_s23 = sphi %s1828_s23, %s22_s23   ;;  %s1772_s22 = sphi %s1826_s22, %s2555_s22   ;;  %s1768_s21 = sphi %s1824_s21, %s2554_s21   ;;  %s1764_s20 = sphi %s1822_s20, %s2553_s20   ;;  %s1760_s19 = sphi %s1820_s19, %s2552_s19   ;;  %s1756_s18 = sphi %s1818_s18, %s2551_s18  }
   0x8   : > { %p56_p0 = scmp.ne.s32.totalorder %s1760_s19, %s1756_s18  ;;  %p1852_p1 = scmp.eq.s32.totalorder %s1302_s24, 0 }
   0x9   : > { %p1856_p2 = scmp.eq.s32.totalorder %s1302_s24, 1  ;;  %p170_p3 = scmp.eq.s32.totalorder %s1303_s25, 1 }
   0xa   : > { %s2524_s26 = scalar_select %p1852_p1, 1, 0 }
   0xb   : > { %s2525_s27 = scalar_select %p1856_p2, 1, 0 }
   0xc   : > { %p1862_p4 = por %p1852_p1, %p56_p0  ;;  %p1304_p5 = scmp.ge.s32.totalorder %s1776_s23, 1 }
   0xd   : > { %p1867_p6 = por %p170_p3, %p56_p0  ;;  %p177_p7 = scmp.lt.s32.totalorder %s1776_s23, 3 }
   0xe   : > { %s2526_s28 = scalar_select %p1862_p4, 1, 0 }
   0xf   : > { %s2527_s29 = scalar_select %p1867_p6, 1, 0 }
  0x10   : > { %p1872_p8 = pnand %p1304_p5, %p177_p7  ;;  %s1778_s6 = smov [#allocation8]  }
  0x11   : > { %s190_s7 = sshll.u32 %s1778_s6, 4  ;;  %s1779_s8 = smov [#allocation10]   ;;  %s191_s7 = int_to_ptr.vmem [resolvable:$true] %s190_s7 }
  0x12   : > { %s2528_s30 = scalar_select %p1872_p8, 1, 0 }
  0x13   : > { %p1455_p10 = pneg %p1872_p8  ;;  %s206_s9 = sshll.u32 %s1779_s8, 4  ;;  %s1885_s9 = int_to_ptr.vmem [resolvable:$true] %s206_s9 }
  0x14   : > { %s1604_s13 = scalar_lea.hbm %s2511_s1, 128 }
  0x15   : > { %p1881_p11 = pnand %p1455_p10, %p1852_p1  ;;  %p1605_p12 = scmp.ne.s32.totalorder %s2511_s1, %s1604_s13 }
  0x16   : > { %p1611_p5 = scmp.lt.u32.totalorder %s1604_s13, %s2511_s1 }
  0x17   : > { %p1606_p13 = pneg %p1881_p11 }
  0x19   : > { %p1607_p0 = pnand %p1606_p13, %p1605_p12 }
  0x1b   : > { %p1608_p3 = pneg %p1607_p0 }
  0x1d   : > { %p1613_p7 = pnand %p1611_p5, %p1608_p3 }
  0x1f   : > { %1616 = shalt.err (!%p1613_p7)
}
  0x20   : > { %s1617_s24 = scalar_lea.vmem %s191_s7, 128  ;;  %p1625_p1 = scmp.lt.s32.totalorder %s191_s7, %s191_s7 }
  0x21   : > { %p1618_p10 = scmp.ne.s32.totalorder %s191_s7, %s1617_s24  ;;  %p1626_p4 = scmp.lt.s32.totalorder %s1617_s24, %s1617_s24 }
  0x23   : > { %p1620_p9 = pnand %p1618_p10, %p1606_p13  ;;  %p1627_p8 = por %p1626_p4, %p1625_p1 }
  0x25   : > { %p1621_p6 = pneg %p1620_p9 }
  0x27   : > { %p1628_p2 = pnand %p1627_p8, %p1621_p6 }
  0x29   : > { %1631 = shalt.err (!%p1628_p2)
}
  0x2a   : > { %1458 = dma.hbm_to_vmem [thread:$0]  (!%p1881_p11), %s2511_s1, 128, %s191_s7, [#allocation9]  }
  0x2b   : > { %s1632_s12 = scalar_lea.hbm %s2514_s4, 2048 }
  0x2c   : > { %p1633_p9 = scmp.ne.s32.totalorder %s2514_s4, %s1632_s12  ;;  %p1639_p2 = scmp.lt.u32.totalorder %s1632_s12, %s2514_s4 }
  0x2e   : > { %p1635_p1 = pnand %p1633_p9, %p1606_p13 }
  0x30   : > { %p1636_p4 = pneg %p1635_p1 }
  0x32   : > { %p1641_p6 = pnand %p1639_p2, %p1636_p4 }
  0x34   : > { %1644 = shalt.err (!%p1641_p6)
}
  0x35   : > { %s1645_s7 = scalar_lea.vmem %s1885_s9, 2048  ;;  %p1653_p3 = scmp.lt.s32.totalorder %s1885_s9, %s1885_s9 }
  0x36   : > { %p1646_p8 = scmp.ne.s32.totalorder %s1885_s9, %s1645_s7  ;;  %p1654_p5 = scmp.lt.s32.totalorder %s1645_s7, %s1645_s7 }
  0x38   : > { %p1648_p12 = pnand %p1646_p8, %p1606_p13  ;;  %p1655_p7 = por %p1654_p5, %p1653_p3 }
  0x3a   : > { %p1649_p0 = pneg %p1648_p12 }
  0x3c   : > { %p1656_p10 = pnand %p1655_p7, %p1649_p0 }
  0x3e   : > { %1659 = shalt.err (!%p1656_p10)
}
  0x3f   : > { %s1780_s17 = smov 128   ;;  %s1781_s24 = smov 8  }
  0x40   : > { %1461 = dma.hbm_to_vmem [thread:$0]  (!%p1881_p11), %s2514_s4, 2048, %s1885_s9, [#allocation9], %s1780_s17, %s1780_s17, %s1781_s24  }
  0x41   : > { %s34_s8 = sadd.s32 1, %s1772_s22  ;;  %s43_s11 = sadd.s32 1, %s1764_s20 }
  0x42   : > { %p36_p13 = scmp.ge.s32.totalorder %s34_s8, 2  ;;  %p50_p9 = scmp.ne.s32.totalorder %s1764_s20, %s1760_s19 }
  0x43   : > { %p51_p1 = scmp.eq.s32.totalorder %s1776_s23, 0  ;;  %p1472_p4 = scmp.lt.s32.totalorder %s1776_s23, 2 }
  0x44   : > { %s2557_s8 = smov (%p36_p13, %s34_s8), 0  ;;  %p2530_p6 = scmp.ne.s32.totalorder %s2525_s27, 0 }
  0x45   : > { %p52_p2 = por %p51_p1, %p50_p9  ;;  %s38_s10 = ssub.s32 %s1772_s22, %s2557_s8 }
  0x46   : > { %p1944_p8 = por %p2530_p6, %p50_p9  ;;  %s220_s13 = sand.u32 1, %s1764_s20  }
  0x47   : > { %p41_p12 = scmp.eq.s32.totalorder %s38_s10, 0  ;;  %s1308_s9 = sshll.u32 %s220_s13, 3 }
  0x48   : > { %s1341_s14 = sshll.u32 %s1772_s22, 7  ;;  %s224_s27 = scalar_lea.vmem [#allocation5], %s1308_s9 }
  0x49   : > { %s1953_s15 = scalar_select %p41_p12, %s1764_s20, %s43_s11  }
  0x4a   : > { %s1958_s17 = scalar_lea.hbm %s2510_s0, %s1341_s14  ;;  %s234_s24 = sshll.u32 %s224_s27, 4  ;;  %s1966_s24 = int_to_ptr.vmem [resolvable:$true] %s234_s24 }
  0x4b   : > { %p1962_p11 = pnand %p1472_p4, %p52_p2  ;;  %s221_s6 = scalar_lea.sflag [#allocation6], %s220_s13 }
  0x4c   : > { %s1660_s11 = scalar_lea.hbm %s1958_s17, 128  ;;  %s1665_s14 = scalar_lea.hbm %s2510_s0, 256 }
  0x4d   : > { %p1661_p0 = scmp.ne.s32.totalorder %s1958_s17, %s1660_s11  ;;  %p1662_p3 = pneg %p1962_p11 }
  0x4e   : > { %p1666_p10 = scmp.lt.u32.totalorder %s1958_s17, %s2510_s0  ;;  %p1667_p13 = scmp.lt.u32.totalorder %s1665_s14, %s1660_s11 }
  0x4f   : > { %p1663_p5 = pnand %p1662_p3, %p1661_p0  ;;  %p1669_p1 = scmp.lt.u32.totalorder %s1660_s11, %s1958_s17 }
  0x50   : > { %p1668_p9 = por %p1667_p13, %p1666_p10 }
  0x51   : > { %p1664_p7 = pneg %p1663_p5 }
  0x52   : > { %p1670_p4 = por %p1669_p1, %p1668_p9 }
  0x54   : > { %p1671_p2 = pnand %p1670_p4, %p1664_p7 }
  0x56   : > { %1674 = shalt.err (!%p1671_p2)
}
  0x57   : > { %s1675_s13 = scalar_lea.vmem %s1966_s24, 128  ;;  %s1782_s27 = smov [#allocation5]  }
  0x58   : > { %p1676_p6 = scmp.ne.s32.totalorder %s1966_s24, %s1675_s13  ;;  %s1680_s10 = sshll.u32 %s1782_s27, 4  ;;  %s1681_s10 = int_to_ptr.vmem [resolvable:$false] %s1680_s10 }
  0x59   : > { %s1682_s9 = scalar_lea.vmem %s1681_s10, 256  ;;  %p1683_p5 = scmp.lt.s32.totalorder %s1966_s24, %s1681_s10 }
  0x5a   : > { %p1678_p12 = pnand %p1676_p6, %p1662_p3  ;;  %p1684_p10 = scmp.lt.s32.totalorder %s1682_s9, %s1675_s13 }
  0x5c   : > { %p1679_p0 = pneg %p1678_p12  ;;  %p1685_p13 = por %p1684_p10, %p1683_p5 }
  0x5e   : > { %p1686_p9 = pnand %p1685_p13, %p1679_p0 }
  0x60   : > { %1689 = shalt.err (!%p1686_p9)
}
  0x61   : > { %1465 = dma.hbm_to_vmem [thread:$0]  (!%p1962_p11), %s1958_s17, 128, %s1966_s24, %s221_s6  }
  0x62   : > { %p2533_p7 = scmp.ne.s32.totalorder %s2528_s30, 0 }
  0x64   : > { %243 = sbr.rel (%p2533_p7) target bundleno = 1391 (0x56f), region = 40 }
  0x6b   : > { %s1996_s11 = sand.u32 1, %s1760_s19   ;;  %p2534_p3 = scmp.ne.s32.totalorder %s2526_s28, 0 }
  0x6c   : > { %s1312_s14 = sshll.u32 %s1996_s11, 3  ;;  %s246_s16 = scalar_lea.sflag [#allocation6], %s1996_s11 }
  0x6d   : > { %s249_s7 = scalar_lea.vmem [#allocation5], %s1312_s14 }
  0x6e   : > { %1743 = dma.done.wait (%p2534_p3), %s246_s16, 128  }
  0x6f   : > { %1745 = vsyncadd (%p2534_p3), %s246_s16, 4294967168  ;;  %p2535_p11 = scmp.ne.s32.totalorder %s2524_s26, 0 }
  0x71   : > { %1747 = dma.done.wait (%p2535_p11), [#allocation9], 2176  }
  0x72   : > { %1749 = vsyncadd (%p2535_p11), [#allocation9], 4294965120  ;;  %v1783_v0 = vmov 0   ;;  %v308_v1 = vld [vmem:[%s249_s7] sm:$0xff]  ;;  %v309_v2 = vld [vmem:[#allocation8] sm:$0xff]  ;;  %vm403_vm0 = vcmask 1043456  }
  0x73   : > { %442 = vmatprep.mubr.bf16.mxu0 %v1783_v0  ;;  %v1316_v3 = vcombine.low %v308_v1, %v308_v1  ;;  %v1319_v4 = vcombine.high %v309_v2, %v309_v2  ;;  %v1318_v5 = vcombine.low %v309_v2, %v309_v2  ;;  %v1317_v7 = vcombine.high %v308_v1, %v308_v1  ;;  %s1338_s24 = sshll.u32 %s1768_s21, 7  ;;  %s283_s25 = scalar_lea.vmem [#allocation11], %s1312_s14 }
  0x74   : > { %vm354_vm1 = vcmask 64512   ;;  %v1784_v24 = vmov -inf   ;;  %v2520_v25 = vmov 0.0   ;;  %vm1786_vm2 = vmmov 0   ;;  %s1202_s6 = sshll.u32 %s283_s25, 4  ;;  %s2460_s10 = scalar_lea.hbm %s2515_s5, %s1338_s24  ;;  %s2462_s6 = int_to_ptr.vmem [resolvable:$true] %s1202_s6 }
  0x75   : > { %317 = vxpose.xlu0.c.b16.start.end [1/1] (short) %v1316_v3, 128  ;;  %1320 = vmatprep.subr.msk.bf16.mxu0 %vm403_vm0, %v1319_v4  ;;  %v405_v6 = vsel %vm403_vm0, %v1318_v5, 0  ;;  %290 = vst [vmem:[#allocation2] sm:$0x1] %v1784_v24  ;;  %291 = vst [vmem:[#allocation3] sm:$0x1] %v2520_v25  ;;  %s1189_s9 = scalar_lea.sflag [#allocation7], %s1996_s11 }
  0x76   : > { %411 = vmatpush1.bf16.msra.mxu0 %v405_v6  ;;  %s1690_s21 = scalar_lea.vmem %s2462_s6, 128  ;;  %s1787_s14 = smov [#allocation11]  }
  0x77   : > { %p1691_p1 = scmp.ne.s32.totalorder %s2462_s6, %s1690_s21  ;;  %s1694_s16 = sshll.u32 %s1787_s14, 4  ;;  %s1695_s16 = int_to_ptr.vmem [resolvable:$false] %s1694_s16 }
  0x78   : > { %s1696_s7 = scalar_lea.vmem %s1695_s16, 256  ;;  %p1697_p6 = scmp.lt.s32.totalorder %s2462_s6, %s1695_s16 }
  0x79   : > { %p1692_p4 = pnand %p1691_p1, %p1944_p8  ;;  %p1698_p12 = scmp.lt.s32.totalorder %s1696_s7, %s1690_s21 }
  0x7b   : > { %p1693_p2 = pneg %p1692_p4  ;;  %p1699_p0 = por %p1698_p12, %p1697_p6 }
  0x7d   : > { %p1700_p5 = pnand %p1699_p0, %p1693_p2 }
  0x92   : > { %333 = vxpose.xlu0.c.b16.start.end [1/1] (short) %v1317_v7, 128 }
  0xdb   : > { %v325_v8 = vpop.trf.xlu0 }
  0xdc   : > { %1321 = vmatmul.mubr.msk.bf16.vlgmr.msra.gmra.mrb[0].mxu0 %vm354_vm1, %v325_v8 }
  0xdd   : > { %452 = vmatprep.mubr.bf16.mxu0 %v1783_v0 }
  0xdf   : > { %v326_v9 = vpop.trf.xlu0 }
  0xe3   : > { %v327_v10 = vpop.trf.xlu0 }
  0xe4   : > { %1322 = vmatmul.mubr.msk.bf16.gmra.mrb[4].mxu0 %vm354_vm1, %v326_v9 }
  0xe5   : > { %462 = vmatprep.mubr.bf16.mxu0 %v1783_v0 }
  0xe7   : > { %v328_v11 = vpop.trf.xlu0 }
  0xeb   : > { %v329_v12 = vpop.trf.xlu0 }
  0xec   : > { %1323 = vmatmul.mubr.msk.bf16.gmra.mrb[8].mxu0 %vm354_vm1, %v327_v10 }
  0xed   : > { %472 = vmatprep.mubr.bf16.mxu0 %v1783_v0 }
  0xef   : > { %v330_v13 = vpop.trf.xlu0 }
  0xf3   : > { %v331_v14 = vpop.trf.xlu0 }
  0xf4   : > { %1324 = vmatmul.mubr.msk.bf16.gmra.mrb[12].mxu0 %vm354_vm1, %v328_v11 }
  0xf5   : > { %482 = vmatprep.mubr.bf16.mxu0 %v1783_v0 }
  0xf7   : > { %v332_v15 = vpop.trf.xlu0 }
  0xfb   : > { %v341_v16 = vpop.trf.xlu0 }
  0xfc   : > { %1325 = vmatmul.mubr.msk.bf16.gmra.mrb[16].mxu0 %vm354_vm1, %v329_v12 }
  0xfd   : > { %492 = vmatprep.mubr.bf16.mxu0 %v1783_v0 }
  0xff   : > { %v342_v17 = vpop.trf.xlu0 }
 0x103   : > { %v343_v18 = vpop.trf.xlu0 }
 0x104   : > { %1326 = vmatmul.mubr.msk.bf16.gmra.mrb[20].mxu0 %vm354_vm1, %v330_v13 }
 0x105   : > { %502 = vmatprep.mubr.bf16.mxu0 %v1783_v0 }
 0x107   : > { %v344_v19 = vpop.trf.xlu0 }
 0x10b   : > { %v345_v20 = vpop.trf.xlu0 }
 0x10c   : > { %1327 = vmatmul.mubr.msk.bf16.gmra.mrb[24].mxu0 %vm354_vm1, %v331_v14 }
 0x10d   : > { %512 = vmatprep.mubr.bf16.mxu0 %v1783_v0 }
 0x10f   : > { %v346_v21 = vpop.trf.xlu0 }
 0x113   : > { %v347_v22 = vpop.trf.xlu0 }
 0x114   : > { %1328 = vmatmul.mubr.msk.bf16.gmra.mrb[28].mxu0 %vm354_vm1, %v332_v15 }
 0x115   : > { %522 = vmatprep.mubr.bf16.mxu0 %v1783_v0 }
 0x117   : > { %v348_v23 = vpop.trf.xlu0 }
 0x11c   : > { %1329 = vmatmul.mubr.msk.bf16.gmra.mrb[32].mxu0 %vm354_vm1, %v341_v16 }
 0x11d   : > { %532 = vmatprep.mubr.bf16.mxu0 %v1783_v0 }
 0x124   : > { %1330 = vmatmul.mubr.msk.bf16.gmra.mrb[36].mxu0 %vm354_vm1, %v342_v17 }
 0x125   : > { %542 = vmatprep.mubr.bf16.mxu0 %v1783_v0 }
 0x12c   : > { %1331 = vmatmul.mubr.msk.bf16.gmra.mrb[40].mxu0 %vm354_vm1, %v343_v18 }
 0x12d   : > { %552 = vmatprep.mubr.bf16.mxu0 %v1783_v0 }
 0x134   : > { %1332 = vmatmul.mubr.msk.bf16.gmra.mrb[44].mxu0 %vm354_vm1, %v344_v19 }
 0x135   : > { %562 = vmatprep.mubr.bf16.mxu0 %v1783_v0 }
 0x13c   : > { %1333 = vmatmul.mubr.msk.bf16.gmra.mrb[48].mxu0 %vm354_vm1, %v345_v20 }
 0x13d   : > { %572 = vmatprep.mubr.bf16.mxu0 %v1783_v0 }
 0x144   : > { %1334 = vmatmul.mubr.msk.bf16.gmra.mrb[52].mxu0 %vm354_vm1, %v346_v21 }
 0x145   : > { %582 = vmatprep.mubr.bf16.mxu0 %v1783_v0 }
 0x14c   : > { %1335 = vmatmul.mubr.msk.bf16.gmra.mrb[56].mxu0 %vm354_vm1, %v347_v22 }
 0x14d   : > { %592 = vmatprep.mubr.bf16.mxu0 %v1783_v0 }
 0x154   : > { %1336 = vmatmul.mubr.msk.bf16.gmra.mrb[60].mxu0 %vm354_vm1, %v348_v23 }
 0x1af   : > { %v2027_v26 = vpop.f32.mrb[0].mxu0 }
 0x1b0   : > { %v2029_v27 = vpop.f32.mrb[1].mxu0 }
 0x1b1   : > { %v2031_v28 = vpop.f32.mrb[2].mxu0 }
 0x1b2   : > { %v2033_v29 = vpop.f32.mrb[3].mxu0 }
 0x1b7   : > { %v2037_v31 = vpop.f32.mrb[4].mxu0 }
 0x1b8   : > { %v2039_v32 = vpop.f32.mrb[5].mxu0 }
 0x1b9   : > { %v2041_v33 = vpop.f32.mrb[6].mxu0 }
 0x1ba   : > { %v2043_v34 = vpop.f32.mrb[7].mxu0 }
 0x1bf   : > { %v2047_v36 = vpop.f32.mrb[8].mxu0 }
 0x1c0   : > { %v604_v37 = vmax.f32 %v2027_v26, %v2047_v36  ;;  %v2051_v38 = vpop.f32.mrb[9].mxu0 }
 0x1c1   : > { %v2053_v39 = vpop.f32.mrb[10].mxu0 }
 0x1c2   : > { %v605_v40 = vmax.f32 %v2031_v28, %v2053_v39  ;;  %v2057_v41 = vpop.f32.mrb[11].mxu0 }
 0x1c7   : > { %v2061_v43 = vpop.f32.mrb[12].mxu0 }
 0x1c8   : > { %v606_v44 = vmax.f32 %v2037_v31, %v2061_v43  ;;  %v2065_v45 = vpop.f32.mrb[13].mxu0 }
 0x1c9   : > { %v2067_v46 = vpop.f32.mrb[14].mxu0 }
 0x1ca   : > { %v607_v47 = vmax.f32 %v2041_v33, %v2067_v46  ;;  %v2071_v48 = vpop.f32.mrb[15].mxu0 }
 0x1cf   : > { %v2075_v50 = vpop.f32.mrb[16].mxu0 }
 0x1d0   : > { %v608_v51 = vmax.f32 %v604_v37, %v2075_v50  ;;  %v2078_v52 = vpop.f32.mrb[17].mxu0 }
 0x1d1   : > { %v2080_v53 = vpop.f32.mrb[18].mxu0 }
 0x1d2   : > { %v609_v54 = vmax.f32 %v605_v40, %v2080_v53  ;;  %v2083_v55 = vpop.f32.mrb[19].mxu0 }
 0x1d7   : > { %v2087_v57 = vpop.f32.mrb[20].mxu0 }
 0x1d8   : > { %v610_v58 = vmax.f32 %v606_v44, %v2087_v57  ;;  %v2090_v59 = vpop.f32.mrb[21].mxu0 }
 0x1d9   : > { %v2092_v60 = vpop.f32.mrb[22].mxu0 }
 0x1da   : > { %v611_v61 = vmax.f32 %v607_v47, %v2092_v60  ;;  %v2095_v62 = vpop.f32.mrb[23].mxu0 }
 0x1df   : > { %v2099_v0 = vpop.f32.mrb[24].mxu0 }
 0x1e0   : > { %v612_v1 = vmax.f32 %v608_v51, %v2099_v0  ;;  %v2102_v2 = vpop.f32.mrb[25].mxu0 }
 0x1e1   : > { %v2104_v3 = vpop.f32.mrb[26].mxu0 }
 0x1e2   : > { %v613_v4 = vmax.f32 %v609_v54, %v2104_v3  ;;  %v2107_v5 = vpop.f32.mrb[27].mxu0 }
 0x1e7   : > { %v2111_v7 = vpop.f32.mrb[28].mxu0 }
 0x1e8   : > { %v614_v8 = vmax.f32 %v610_v58, %v2111_v7  ;;  %v2114_v9 = vpop.f32.mrb[29].mxu0 }
 0x1e9   : > { %2536 = vst [vmem:[#allocation15_spill] sm:$0xff] %v2114_v9  ;;  %v2116_v10 = vpop.f32.mrb[30].mxu0 }
 0x1ea   : > { %v615_v11 = vmax.f32 %v611_v61, %v2116_v10  ;;  %v2119_v12 = vpop.f32.mrb[31].mxu0 }
 0x1eb   : > { %2537 = vst [vmem:[#allocation16_spill] sm:$0xff] %v2119_v12  ;;  %v2177_v12 = vld [vmem:[#allocation2] sm:$0x1] }
 0x1ef   : > { %v2123_v14 = vpop.f32.mrb[32].mxu0 }
 0x1f0   : > { %v616_v15 = vmax.f32 %v612_v1, %v2123_v14  ;;  %v526_v16 = vpop.f32.mrb[33].mxu0 }
 0x1f1   : > { %v2126_v17 = vpop.f32.mrb[34].mxu0 }
 0x1f2   : > { %v617_v18 = vmax.f32 %v613_v4, %v2126_v17  ;;  %v530_v19 = vpop.f32.mrb[35].mxu0 }
 0x1f3   : > { %v796_v20 = vpack.c.bf16 %v530_v19, %v526_v16 }
 0x1f5   : > { %836 = vxpose.xlu1.c.b16.start [1/8] %v796_v20, 128 }
 0x1f7   : > { %v2129_v21 = vpop.f32.mrb[36].mxu0 }
 0x1f8   : > { %v618_v22 = vmax.f32 %v614_v8, %v2129_v21  ;;  %v536_v23 = vpop.f32.mrb[37].mxu0 }
 0x1f9   : > { %v2132_v24 = vpop.f32.mrb[38].mxu0 }
 0x1fa   : > { %v619_v37 = vmax.f32 %v615_v11, %v2132_v24  ;;  %v540_v40 = vpop.f32.mrb[39].mxu0 }
 0x1fb   : > { %v797_v44 = vpack.c.bf16 %v540_v40, %v536_v23 }
 0x1fd   : > { %837 = vxpose.xlu1.c.b16.cont [2/8] %v797_v44, 128 }
 0x1ff   : > { %v2135_v47 = vpop.f32.mrb[40].mxu0 }
 0x200   : > { %v620_v51 = vmax.f32 %v616_v15, %v2135_v47  ;;  %v546_v54 = vpop.f32.mrb[41].mxu0 }
 0x201   : > { %v2138_v58 = vpop.f32.mrb[42].mxu0 }
 0x202   : > { %v621_v61 = vmax.f32 %v617_v18, %v2138_v58  ;;  %v550_v1 = vpop.f32.mrb[43].mxu0 }
 0x203   : > { %v798_v4 = vpack.c.bf16 %v550_v1, %v546_v54 }
 0x205   : > { %838 = vxpose.xlu1.c.b16.cont [3/8] %v798_v4, 128 }
 0x207   : > { %v2141_v8 = vpop.f32.mrb[44].mxu0 }
 0x208   : > { %v622_v16 = vmax.f32 %v618_v22, %v2141_v8  ;;  %v556_v11 = vpop.f32.mrb[45].mxu0 }
 0x209   : > { %v2144_v19 = vpop.f32.mrb[46].mxu0 }
 0x20a   : > { %v623_v20 = vmax.f32 %v619_v37, %v2144_v19  ;;  %v560_v23 = vpop.f32.mrb[47].mxu0 }
 0x20b   : > { %v799_v40 = vpack.c.bf16 %v560_v23, %v556_v11 }
 0x20d   : > { %839 = vxpose.xlu1.c.b16.cont [4/8] %v799_v40, 128 }
 0x20f   : > { %v2147_v15 = vpop.f32.mrb[48].mxu0 }
 0x210   : > { %v624_v44 = vmax.f32 %v620_v51, %v2147_v15  ;;  %v566_v18 = vpop.f32.mrb[49].mxu0 }
 0x211   : > { %v2150_v25 = vpop.f32.mrb[50].mxu0 }
 0x212   : > { %v625_v54 = vmax.f32 %v621_v61, %v2150_v25  ;;  %v570_v1 = vpop.f32.mrb[51].mxu0 }
 0x213   : > { %v800_v4 = vpack.c.bf16 %v570_v1, %v566_v18 }
 0x215   : > { %840 = vxpose.xlu1.c.b16.cont [5/8] %v800_v4, 128 }
 0x217   : > { %v2153_v22 = vpop.f32.mrb[52].mxu0 }
 0x218   : > { %v626_v13 = vmax.f32 %v622_v16, %v2153_v22  ;;  %v576_v37 = vpop.f32.mrb[53].mxu0 }
 0x219   : > { %v2156_v6 = vpop.f32.mrb[54].mxu0 }
 0x21a   : > { %v627_v11 = vmax.f32 %v623_v20, %v2156_v6  ;;  %v580_v23 = vpop.f32.mrb[55].mxu0 }
 0x21b   : > { %v801_v40 = vpack.c.bf16 %v580_v23, %v576_v37 }
 0x21d   : > { %841 = vxpose.xlu1.c.b16.cont [6/8] %v801_v40, 128 }
 0x21f   : > { %v2159_v51 = vpop.f32.mrb[56].mxu0 }
 0x220   : > { %v628_v63 = vmax.f32 %v624_v44, %v2159_v51  ;;  %v586_v61 = vpop.f32.mrb[57].mxu0 }
 0x221   : > { %v2162_v56 = vpop.f32.mrb[58].mxu0 }
 0x222   : > { %v629_v18 = vmax.f32 %v625_v54, %v2162_v56  ;;  %v590_v1 = vpop.f32.mrb[59].mxu0  ;;  %v2538_v54 = vpack.c.bf16 %v2033_v29, %v2029_v27  ;;  %v2541_v29 = vpack.c.bf16 %v2071_v48, %v2065_v45 }
 0x223   : > { %v802_v4 = vpack.c.bf16 %v590_v1, %v586_v61  ;;  %v646_v61 = vlaneseq }
 0x224   : > { %v632_v16 = vmax.f32 %v628_v63, %v629_v18 }
 0x225   : > { %842 = vxpose.xlu1.c.b16.cont [7/8] %v802_v4, 128  ;;  %v647_v4 = vshrl.u32 %v646_v61, 7 }
 0x227   : > { %v2165_v49 = vpop.f32.mrb[60].mxu0 }
 0x228   : > { %v630_v20 = vmax.f32 %v626_v13, %v2165_v49  ;;  %v596_v42 = vpop.f32.mrb[61].mxu0  ;;  %v2539_v13 = vpack.c.bf16 %v2043_v34, %v2039_v32 }
 0x229   : > { %v2168_v37 = vpop.f32.mrb[62].mxu0 }
 0x22a   : > { %v631_v23 = vmax.f32 %v627_v11, %v2168_v37  ;;  %v600_v40 = vpop.f32.mrb[63].mxu0 }
 0x22b   : > { %v803_v44 = vpack.c.bf16 %v600_v40, %v596_v42 }
 0x22c   : > { %v633_v35 = vmax.f32 %v630_v20, %v631_v23 }
 0x22d   : > { %843 = vxpose.xlu1.c.b16.end [8/8] %v803_v44, 128 }
 0x22e   : > { %v634_v30 = vmax.f32 %v632_v16, %v633_v35  ;;  %v2540_v35 = vpack.c.bf16 %v2057_v41, %v2051_v38  ;;  %v2182_v16 = vsub.s32 0, %v647_v4 }
 0x230   : > { %v635_v9 = vrot.slane %v634_v30, 4 }
 0x231   : > { %820 = vxpose.xlu1.c.b16.start [1/8] %v2538_v54, 128 }
 0x232   : > { %v636_v63 = vmax.f32 %v634_v30, %v635_v9 }
 0x234   : > { %v637_v18 = vrot.slane %v636_v63, 2 }
 0x235   : > { %821 = vxpose.xlu1.c.b16.cont [2/8] %v2539_v13, 128 }
 0x236   : > { %v638_v1 = vmax.f32 %v636_v63, %v637_v18  ;;  %v2544_v18 = vpack.c.bf16 %v2107_v5, %v2102_v2 }
 0x238   : > { %v639_v11 = vrot.slane %v638_v1, 1 }
 0x239   : > { %822 = vxpose.xlu1.c.b16.cont [3/8] %v2540_v35, 128  ;;  %v2545_v35 = vld [vmem:[#allocation16_spill] sm:$0xff] }
 0x23a   : > { %v640_v42 = vmax.f32 %v638_v1, %v639_v11 }
 0x23c   : > { %v2185_v27 = vmax.f32 %v2177_v12, %v640_v42  ;;  %v2546_v42 = vld [vmem:[#allocation15_spill] sm:$0xff] }
 0x23d   : > { %823 = vxpose.xlu1.c.b16.cont [4/8] %v2541_v29, 128  ;;  %v2547_v29 = vpack.c.bf16 %v2545_v35, %v2546_v42 }
 0x23e   : > { %v642_v30 = vsub.f32 %v2177_v12, %v2185_v27  ;;  %v2194_v32 = vrot.slane %v2185_v27, %v2182_v16  ;;  %1019 = vst [vmem:[#allocation2] sm:$0x1] %v2185_v27 }
 0x240   : > { %v651_v34 = vsub.f32 %v2027_v26, %v2194_v32  ;;  %v652_v38 = vsub.f32 %v2031_v28, %v2194_v32  ;;  %v653_v41 = vsub.f32 %v2037_v31, %v2194_v32  ;;  %v654_v45 = vsub.f32 %v2041_v33, %v2194_v32 }
 0x241   : > { %v655_v48 = vsub.f32 %v2047_v36, %v2194_v32  ;;  %v656_v9 = vsub.f32 %v2053_v39, %v2194_v32  ;;  %v657_v20 = vsub.f32 %v2061_v43, %v2194_v32  ;;  %v2542_v26 = vpack.c.bf16 %v2083_v55, %v2078_v52 }
 0x242   : > { %v658_v28 = vsub.f32 %v2067_v46, %v2194_v32  ;;  %v659_v31 = vsub.f32 %v2075_v50, %v2194_v32  ;;  %v660_v33 = vsub.f32 %v2080_v53, %v2194_v32  ;;  %v661_v36 = vsub.f32 %v2087_v57, %v2194_v32 }
 0x243   : > { %824 = vxpose.xlu1.c.b16.cont [5/8] %v2542_v26, 128  ;;  %v662_v39 = vsub.f32 %v2092_v60, %v2194_v32  ;;  %v663_v43 = vsub.f32 %v2099_v0, %v2194_v32  ;;  %v664_v52 = vsub.f32 %v2104_v3, %v2194_v32  ;;  %v665_v46 = vsub.f32 %v2111_v7, %v2194_v32 }
 0x244   : > { %v666_v50 = vsub.f32 %v2116_v10, %v2194_v32  ;;  %v667_v53 = vsub.f32 %v2123_v14, %v2194_v32  ;;  %v668_v55 = vsub.f32 %v2126_v17, %v2194_v32  ;;  %v669_v57 = vsub.f32 %v2129_v21, %v2194_v32 }
 0x245   : > { %v670_v60 = vsub.f32 %v2132_v24, %v2194_v32  ;;  %v671_v0 = vsub.f32 %v2135_v47, %v2194_v32  ;;  %v672_v3 = vsub.f32 %v2138_v58, %v2194_v32  ;;  %v2543_v7 = vpack.c.bf16 %v2095_v62, %v2090_v59 }
 0x246   : > { %v673_v10 = vsub.f32 %v2141_v8, %v2194_v32  ;;  %v674_v14 = vsub.f32 %v2144_v19, %v2194_v32  ;;  %v675_v17 = vsub.f32 %v2147_v15, %v2194_v32  ;;  %v676_v21 = vsub.f32 %v2150_v25, %v2194_v32 }
 0x247   : > { %825 = vxpose.xlu1.c.b16.cont [6/8] %v2543_v7, 128  ;;  %v677_v24 = vsub.f32 %v2153_v22, %v2194_v32  ;;  %v678_v47 = vsub.f32 %v2156_v6, %v2194_v32  ;;  %v679_v59 = vsub.f32 %v2159_v51, %v2194_v32  ;;  %v680_v62 = vsub.f32 %v2162_v56, %v2194_v32 }
 0x248   : > { %v681_v23 = vsub.f32 %v2165_v49, %v2194_v32  ;;  %v682_v40 = vsub.f32 %v2168_v37, %v2194_v32  ;;  %v683_v44 = vmul.f32 1.442695, %v651_v34  ;;  %v685_v54 = vmul.f32 1.442695, %v652_v38 }
 0x249   : > { %v687_v63 = vmul.f32 1.442695, %v653_v41  ;;  %v689_v61 = vmul.f32 1.442695, %v654_v45  ;;  %v691_v13 = vmul.f32 1.442695, %v655_v48 }
 0x24a   : > { %1536 = vpow2.f32 %v683_v44  ;;  %v693_v1 = vmul.f32 1.442695, %v656_v9  ;;  %v695_v4 = vmul.f32 1.442695, %v657_v20  ;;  %v697_v11 = vmul.f32 1.442695, %v658_v28 }
 0x24b   : > { %826 = vxpose.xlu1.c.b16.cont [7/8] %v2544_v18, 128  ;;  %1538 = vpow2.f32 %v685_v54  ;;  %v699_v34 = vmul.f32 1.442695, %v659_v31  ;;  %v701_v38 = vmul.f32 1.442695, %v660_v33  ;;  %v703_v41 = vmul.f32 1.442695, %v661_v36 }
 0x24c   : > { %1540 = vpow2.f32 %v687_v63  ;;  %v705_v2 = vmul.f32 1.442695, %v662_v39  ;;  %v707_v5 = vmul.f32 1.442695, %v663_v43  ;;  %v709_v45 = vmul.f32 1.442695, %v664_v52 }
 0x24d   : > { %1542 = vpow2.f32 %v689_v61  ;;  %v711_v9 = vmul.f32 1.442695, %v665_v46  ;;  %v713_v26 = vmul.f32 1.442695, %v666_v50  ;;  %v715_v31 = vmul.f32 1.442695, %v667_v53 }
 0x24e   : > { %1544 = vpow2.f32 %v691_v13  ;;  %v717_v43 = vmul.f32 1.442695, %v668_v55  ;;  %v719_v46 = vmul.f32 1.442695, %v669_v57  ;;  %v721_v44 = vmul.f32 1.442695, %v670_v60 }
 0x24f   : > { %827 = vxpose.xlu1.c.b16.end [8/8] %v2547_v29, 128  ;;  %1546 = vpow2.f32 %v693_v1  ;;  %v723_v63 = vmul.f32 1.442695, %v671_v0  ;;  %v725_v57 = vmul.f32 1.442695, %v672_v3  ;;  %v727_v60 = vmul.f32 1.442695, %v673_v10 }
 0x250   : > { %1548 = vpow2.f32 %v695_v4  ;;  %v729_v58 = vmul.f32 1.442695, %v674_v14  ;;  %v731_v8 = vmul.f32 1.442695, %v675_v17  ;;  %v733_v19 = vmul.f32 1.442695, %v676_v21 }
 0x251   : > { %1550 = vpow2.f32 %v697_v11  ;;  %v735_v15 = vmul.f32 1.442695, %v677_v24  ;;  %v737_v25 = vmul.f32 1.442695, %v678_v47  ;;  %v739_v22 = vmul.f32 1.442695, %v679_v59 }
 0x252   : > { %1552 = vpow2.f32 %v699_v34  ;;  %v741_v6 = vmul.f32 1.442695, %v680_v62 }
 0x253   : > { %1554 = vpow2.f32 %v701_v38 }
 0x254   : > { %v2273_v48 = vpop.eup %1536  ;;  %1556 = vpow2.f32 %v703_v41  ;;  %v743_v41 = vmul.f32 1.442695, %v681_v23 }
 0x255   : > { %v2275_v20 = vpop.eup %1538  ;;  %1558 = vpow2.f32 %v705_v2 }
 0x256   : > { %v2277_v28 = vpop.eup %1540  ;;  %1560 = vpow2.f32 %v707_v5  ;;  %v749_v33 = vadd.f32 %v2275_v20, %v2273_v48  ;;  %v804_v36 = vpack.c.bf16 %v2275_v20, %v2273_v48  ;;  %v745_v5 = vmul.f32 1.442695, %v682_v40 }
 0x257   : > { %v2283_v39 = vpop.eup %1542  ;;  %1562 = vpow2.f32 %v709_v45 }
 0x258   : > { %v2285_v52 = vpop.eup %1544  ;;  %1564 = vpow2.f32 %v711_v9  ;;  %v750_v50 = vadd.f32 %v2277_v28, %v749_v33  ;;  %v805_v7 = vpack.c.bf16 %v2283_v39, %v2277_v28 }
 0x259   : > { %v2290_v53 = vpop.eup %1546  ;;  %1566 = vpow2.f32 %v713_v26 }
 0x25a   : > { %v2292_v54 = vpop.eup %1548  ;;  %1568 = vpow2.f32 %v715_v31  ;;  %v751_v61 = vadd.f32 %v2283_v39, %v750_v50  ;;  %v806_v55 = vpack.c.bf16 %v2290_v53, %v2285_v52 }
 0x25b   : > { %v2297_v18 = vpop.eup %1550  ;;  %1570 = vpow2.f32 %v717_v43 }
 0x25c   : > { %v2302_v13 = vpop.eup %1552  ;;  %1572 = vpow2.f32 %v719_v46  ;;  %v752_v0 = vadd.f32 %v2285_v52, %v751_v61  ;;  %v807_v1 = vpack.c.bf16 %v2297_v18, %v2292_v54 }
 0x25d   : > { %v2310_v4 = vpop.eup %1554  ;;  %1574 = vpow2.f32 %v721_v44 }
 0x25e   : > { %v2315_v3 = vpop.eup %1556  ;;  %1576 = vpow2.f32 %v723_v63  ;;  %v753_v10 = vadd.f32 %v2290_v53, %v752_v0  ;;  %v808_v11 = vpack.c.bf16 %v2310_v4, %v2302_v13 }
 0x25f   : > { %v2323_v35 = vpop.eup %1558  ;;  %1578 = vpow2.f32 %v725_v57 }
 0x260   : > { %v2328_v14 = vpop.eup %1560  ;;  %1580 = vpow2.f32 %v727_v60  ;;  %v754_v17 = vadd.f32 %v2292_v54, %v753_v10  ;;  %v809_v42 = vpack.c.bf16 %v2323_v35, %v2315_v3 }
 0x261   : > { %v2336_v29 = vpop.eup %1562  ;;  %1582 = vpow2.f32 %v729_v58 }
 0x262   : > { %v2341_v21 = vpop.eup %1564  ;;  %1584 = vpow2.f32 %v731_v8  ;;  %v755_v24 = vadd.f32 %v2297_v18, %v754_v17  ;;  %v810_v34 = vpack.c.bf16 %v2336_v29, %v2328_v14 }
 0x263   : > { %v2349_v38 = vpop.eup %1566  ;;  %1586 = vpow2.f32 %v733_v19 }
 0x264   : > { %v1569_v47 = vpop.eup %1568  ;;  %1588 = vpow2.f32 %v735_v15  ;;  %v756_v51 = vadd.f32 %v2302_v13, %v755_v24  ;;  %v811_v59 = vpack.c.bf16 %v2349_v38, %v2341_v21 }
 0x265   : > { %v1571_v2 = vpop.eup %1570  ;;  %1590 = vpow2.f32 %v737_v25 }
 0x266   : > { %v1573_v45 = vpop.eup %1572  ;;  %1592 = vpow2.f32 %v739_v22  ;;  %v757_v56 = vadd.f32 %v2310_v4, %v756_v51  ;;  %v812_v62 = vpack.c.bf16 %v1571_v2, %v1569_v47  ;;  %v2548_v22 = vmov 0.0  }
 0x267   : > { %v1575_v9 = vpop.eup %1574  ;;  %1594 = vpow2.f32 %v741_v6 }
 0x268   : > { %v1577_v49 = vpop.eup %1576  ;;  %1596 = vpow2.f32 %v743_v41  ;;  %v758_v23 = vadd.f32 %v2315_v3, %v757_v56  ;;  %1342 = vmatprep.subr.bf16.mxu1 %v812_v62  ;;  %v813_v26 = vpack.c.bf16 %v1575_v9, %v1573_v45  ;;  %v747_v56 = vld [vmem:[#allocation3] sm:$0x1] }
 0x269   : > { %v1579_v31 = vpop.eup %1578  ;;  %1598 = vpow2.f32 %v745_v5  ;;  %1343 = vmatpush3.bf16.msra.mxu1 %v804_v36 }
 0x26a   : > { %v1581_v37 = vpop.eup %1580  ;;  %v759_v32 = vadd.f32 %v2323_v35, %v758_v23  ;;  %1344 = vmatprep.subr.bf16.mxu1 %v813_v26  ;;  %v814_v40 = vpack.c.bf16 %v1579_v31, %v1577_v49 }
 0x26b   : > { %v1583_v33 = vpop.eup %1582 }
 0x26c   : > { %v1585_v43 = vpop.eup %1584  ;;  %v760_v46 = vadd.f32 %v2328_v14, %v759_v32  ;;  %v815_v50 = vpack.c.bf16 %v1583_v33, %v1581_v37  ;;  %v643_v14 = vmul.f32 1.442695, %v642_v30 }
 0x26d   : > { %v1587_v44 = vpop.eup %1586  ;;  %1345 = vmatpush3.bf16.msra.mxu1 %v805_v7 }
 0x26e   : > { %v1589_v63 = vpop.eup %1588  ;;  %v761_v61 = vadd.f32 %v2336_v29, %v760_v46  ;;  %1346 = vmatprep.subr.bf16.mxu1 %v814_v40  ;;  %v816_v48 = vpack.c.bf16 %v1587_v44, %v1585_v43  ;;  %1600 = vpow2.f32 %v643_v14 }
 0x26f   : > { %v1591_v20 = vpop.eup %1590 }
 0x270   : > { %v1593_v36 = vpop.eup %1592  ;;  %v762_v57 = vadd.f32 %v2341_v21, %v761_v61  ;;  %v817_v60 = vpack.c.bf16 %v1591_v20, %v1589_v63 }
 0x271   : > { %v1595_v0 = vpop.eup %1594  ;;  %1347 = vmatpush3.bf16.msra.mxu1 %v806_v55 }
 0x272   : > { %v1597_v58 = vpop.eup %1596  ;;  %v763_v8 = vadd.f32 %v2349_v38, %v762_v57  ;;  %1348 = vmatprep.subr.bf16.mxu1 %v815_v50  ;;  %v818_v28 = vpack.c.bf16 %v1595_v0, %v1593_v36 }
 0x273   : > { %v1599_v39 = vpop.eup %1598 }
 0x274   : > { %v764_v7 = vadd.f32 %v1569_v47, %v763_v8  ;;  %v819_v10 = vpack.c.bf16 %v1599_v39, %v1597_v58  ;;  %v1065_v8 = vld [vmem:[#allocation10 + $0x8] sm:$0xff] }
 0x275   : > { %1349 = vmatpush3.bf16.msra.mxu1 %v807_v1 }
 0x276   : > { %v765_v19 = vadd.f32 %v1571_v2, %v764_v7  ;;  %1350 = vmatprep.subr.bf16.mxu1 %v816_v48 }
 0x277   : > { %v844_v15 = vpop.trf.xlu1 }
 0x278   : > { %v766_v17 = vadd.f32 %v1573_v45, %v765_v19  ;;  %884 = vmatprep.mubr.bf16.mxu1 %v844_v15  ;;  %v1601_v45 = vpop.eup %1600 }
 0x279   : > { %1351 = vmatpush3.bf16.msra.mxu1 %v808_v11 }
 0x27a   : > { %v767_v52 = vadd.f32 %v1575_v9, %v766_v17  ;;  %1352 = vmatprep.subr.bf16.mxu1 %v817_v60 }
 0x27b   : > { %v845_v53 = vpop.trf.xlu1 }
 0x27c   : > { %v768_v55 = vadd.f32 %v1577_v49, %v767_v52  ;;  %v748_v49 = vmul.f32 %v1601_v45, %v747_v56 }
 0x27d   : > { %1353 = vmatpush3.bf16.msra.mxu1 %v809_v42 }
 0x27e   : > { %v769_v25 = vadd.f32 %v1579_v31, %v768_v55  ;;  %1354 = vmatprep.subr.bf16.mxu1 %v818_v28 }
 0x27f   : > { %v846_v54 = vpop.trf.xlu1 }
 0x280   : > { %v770_v18 = vadd.f32 %v1581_v37, %v769_v25 }
 0x281   : > { %1355 = vmatpush3.bf16.msra.mxu1 %v810_v34 }
 0x282   : > { %v771_v1 = vadd.f32 %v1583_v33, %v770_v18  ;;  %1356 = vmatprep.subr.bf16.mxu1 %v819_v10  ;;  %v969_v33 = vrot.slane %v1601_v45, %v2182_v16  ;;  %v1066_v18 = vld [vmem:[#allocation10 + $0x10] sm:$0xff] }
 0x283   : > { %v847_v13 = vpop.trf.xlu1 }
 0x284   : > { %v772_v4 = vadd.f32 %v1585_v43, %v771_v1  ;;  %v1067_v1 = vld [vmem:[#allocation10 + $0x18] sm:$0xff] }
 0x285   : > { %1357 = vmatpush3.bf16.msra.mxu1 %v811_v59 }
 0x286   : > { %v773_v11 = vadd.f32 %v1587_v44, %v772_v4  ;;  %1417 = vmatprep.subr.bf16.mxu1 %v2548_v22  ;;  %v2401_v44 = vmul.f32 0.0, %v969_v33 }
 0x287   : > { %v848_v3 = vpop.trf.xlu1 }
 0x288   : > { %v774_v35 = vadd.f32 %v1589_v63, %v773_v11 }
 0x28a   : > { %v775_v42 = vadd.f32 %v1591_v20, %v774_v35 }
 0x28b   : > { %v849_v24 = vpop.trf.xlu1 }
 0x28c   : > { %v776_v6 = vadd.f32 %v1593_v36, %v775_v42 }
 0x28e   : > { %v777_v29 = vadd.f32 %v1595_v0, %v776_v6 }
 0x28f   : > { %v850_v34 = vpop.trf.xlu1 }
 0x290   : > { %v778_v47 = vadd.f32 %v1597_v58, %v777_v29  ;;  %v1064_v58 = vld [vmem:[#allocation10] sm:$0xff] }
 0x292   : > { %v779_v41 = vadd.f32 %v1599_v39, %v778_v47 }
 0x293   : > { %v851_v51 = vpop.trf.xlu1 }
 0x294   : > { %v780_v21 = vrot.slane %v779_v41, 4 }
 0x296   : > { %v781_v38 = vadd.f32 %v780_v21, %v779_v41  ;;  %v1069_v21 = vld [vmem:[#allocation10 + $0x28] sm:$0xff] }
 0x298   : > { %v782_v2 = vrot.slane %v781_v38, 2 }
 0x299   : > { %v828_v59 = vpop.trf.xlu1 }
 0x29a   : > { %885 = vmatmul.mubr.bf16.vlgmr.msra.gmra.mrb[0].mxu1 %v828_v59  ;;  %v783_v5 = vadd.f32 %v782_v2, %v781_v38 }
 0x29b   : > { %892 = vmatprep.mubr.bf16.mxu1 %v845_v53 }
 0x29c   : > { %v784_v62 = vrot.slane %v783_v5, 1 }
 0x29d   : > { %v829_v9 = vpop.trf.xlu1 }
 0x29e   : > { %v785_v12 = vadd.f32 %v784_v62, %v783_v5 }
 0x2a0   : > { %v786_v27 = vadd.f32 %v785_v12, %v748_v49 }
 0x2a1   : > { %v830_v30 = vpop.trf.xlu1 }
 0x2a2   : > { %893 = vmatmul.mubr.bf16.gmra.mrb[4].mxu1 %v829_v9  ;;  %787 = vst [vmem:[#allocation3] sm:$0x1] %v786_v27 }
 0x2a3   : > { %900 = vmatprep.mubr.bf16.mxu1 %v846_v54 }
 0x2a5   : > { %v831_v23 = vpop.trf.xlu1 }
 0x2a9   : > { %v832_v26 = vpop.trf.xlu1  ;;  %v1039_v40 = vld [vmem:[#allocation3] sm:$0x1] }
 0x2aa   : > { %901 = vmatmul.mubr.bf16.gmra.mrb[8].mxu1 %v830_v30  ;;  %1602 = vrcp.f32 %v1039_v40 }
 0x2ab   : > { %908 = vmatprep.mubr.bf16.mxu1 %v847_v13 }
 0x2ad   : > { %v833_v31 = vpop.trf.xlu1 }
 0x2b1   : > { %v834_v37 = vpop.trf.xlu1 }
 0x2b2   : > { %909 = vmatmul.mubr.bf16.gmra.mrb[12].mxu1 %v831_v23 }
 0x2b3   : > { %916 = vmatprep.mubr.bf16.mxu1 %v848_v3 }
 0x2b4   : > { %v1603_v46 = vpop.eup %1602 }
 0x2b5   : > { %v835_v32 = vpop.trf.xlu1  ;;  %v2404_v20 = vrot.slane %v1603_v46, %v2182_v16 }
 0x2ba   : > { %917 = vmatmul.mubr.bf16.gmra.mrb[16].mxu1 %v832_v26  ;;  %v1070_v26 = vld [vmem:[#allocation10 + $0x30] sm:$0xff] }
 0x2bb   : > { %924 = vmatprep.mubr.bf16.mxu1 %v849_v24 }
 0x2c2   : > { %925 = vmatmul.mubr.bf16.gmra.mrb[20].mxu1 %v833_v31  ;;  %v1071_v31 = vld [vmem:[#allocation10 + $0x38] sm:$0xff] }
 0x2c3   : > { %932 = vmatprep.mubr.bf16.mxu1 %v850_v34 }
 0x2ca   : > { %933 = vmatmul.mubr.bf16.gmra.mrb[24].mxu1 %v834_v37 }
 0x2cb   : > { %940 = vmatprep.mubr.bf16.mxu1 %v851_v51  ;;  %v1068_v51 = vld [vmem:[#allocation10 + $0x20] sm:$0xff] }
 0x2d2   : > { %941 = vmatmul.mubr.bf16.gmra.mrb[28].mxu1 %v835_v32 }
 0x2d3   : > { %1433 = vmatprep.mubr.msk.bf16.mxu1 %vm1786_vm2, %v2548_v22 }
 0x36d   : > { %v1358_v43 = vpop.f32.mrb[0].mxu1 }
 0x36e   : > { %v1359_v50 = vpop.f32.mrb[1].mxu1 }
 0x36f   : > { %v1360_v63 = vadd.f32 %v1359_v50, %v1358_v43  ;;  %v1361_v61 = vpop.f32.mrb[2].mxu1 }
 0x370   : > { %v1362_v48 = vpop.f32.mrb[3].mxu1 }
 0x371   : > { %v987_v36 = vadd.f32 %v1360_v63, %v2401_v44  ;;  %v1363_v57 = vadd.f32 %v1362_v48, %v1361_v61 }
 0x373   : > { %v1048_v60 = vmul.f32 %v2404_v20, %v987_v36  ;;  %v988_v0 = vadd.f32 %v1363_v57, %v2401_v44 }
 0x375   : > { %v1049_v28 = vmul.f32 %v2404_v20, %v988_v0  ;;  %v1364_v39 = vpop.f32.mrb[4].mxu1  ;;  %v1080_v10 = vmul.f32 %v1064_v58, %v1048_v60  ;;  %v1072_v0 = vld [vmem:[#allocation10 + $0x40] sm:$0xff]  ;;  %v1073_v58 = vld [vmem:[#allocation10 + $0x48] sm:$0xff] }
 0x376   : > { %v1365_v7 = vpop.f32.mrb[5].mxu1 }
 0x377   : > { %v1081_v19 = vmul.f32 %v1065_v8, %v1049_v28  ;;  %v1366_v15 = vadd.f32 %v1365_v7, %v1364_v39  ;;  %v1367_v17 = vpop.f32.mrb[6].mxu1 }
 0x378   : > { %v1368_v52 = vpop.f32.mrb[7].mxu1 }
 0x379   : > { %v989_v16 = vadd.f32 %v1366_v15, %v2401_v44  ;;  %v1369_v53 = vadd.f32 %v1368_v52, %v1367_v17  ;;  %v1097_v55 = vpack.c.bf16 %v1081_v19, %v1080_v10 }
 0x37b   : > { %v1050_v25 = vmul.f32 %v2404_v20, %v989_v16  ;;  %v990_v54 = vadd.f32 %v1369_v53, %v2401_v44  ;;  %1418 = vmatpush3.bf16.msra.mxu1 %v1097_v55 }
 0x37c   : > { %1419 = vmatprep.subr.bf16.mxu1 %v2548_v22 }
 0x37d   : > { %v1051_v13 = vmul.f32 %v2404_v20, %v990_v54  ;;  %v1370_v4 = vpop.f32.mrb[8].mxu1  ;;  %v1082_v3 = vmul.f32 %v1066_v18, %v1050_v25  ;;  %v1074_v54 = vld [vmem:[#allocation10 + $0x50] sm:$0xff]  ;;  %v1075_v18 = vld [vmem:[#allocation10 + $0x58] sm:$0xff] }
 0x37e   : > { %v1371_v11 = vpop.f32.mrb[9].mxu1 }
 0x37f   : > { %v1083_v35 = vmul.f32 %v1067_v1, %v1051_v13  ;;  %v1372_v42 = vadd.f32 %v1371_v11, %v1370_v4  ;;  %v1373_v24 = vpop.f32.mrb[10].mxu1 }
 0x380   : > { %v1374_v6 = vpop.f32.mrb[11].mxu1 }
 0x381   : > { %v991_v14 = vadd.f32 %v1372_v42, %v2401_v44  ;;  %v1375_v29 = vadd.f32 %v1374_v6, %v1373_v24  ;;  %v1098_v34 = vpack.c.bf16 %v1083_v35, %v1082_v3 }
 0x383   : > { %v1052_v47 = vmul.f32 %v2404_v20, %v991_v14  ;;  %v992_v41 = vadd.f32 %v1375_v29, %v2401_v44  ;;  %1420 = vmatpush3.bf16.msra.mxu1 %v1098_v34 }
 0x384   : > { %1421 = vmatprep.subr.bf16.mxu1 %v2548_v22 }
 0x385   : > { %v1053_v38 = vmul.f32 %v2404_v20, %v992_v41  ;;  %v1376_v59 = vpop.f32.mrb[12].mxu1  ;;  %v1084_v5 = vmul.f32 %v1068_v51, %v1052_v47  ;;  %v1076_v41 = vld [vmem:[#allocation10 + $0x60] sm:$0xff]  ;;  %v1077_v51 = vld [vmem:[#allocation10 + $0x68] sm:$0xff] }
 0x386   : > { %v1377_v2 = vpop.f32.mrb[13].mxu1 }
 0x387   : > { %v1085_v45 = vmul.f32 %v1069_v21, %v1053_v38  ;;  %v1378_v56 = vadd.f32 %v1377_v2, %v1376_v59  ;;  %v1379_v62 = vpop.f32.mrb[14].mxu1 }
 0x388   : > { %v1380_v9 = vpop.f32.mrb[15].mxu1 }
 0x389   : > { %v993_v49 = vadd.f32 %v1378_v56, %v2401_v44  ;;  %v1381_v12 = vadd.f32 %v1380_v9, %v1379_v62  ;;  %v1099_v27 = vpack.c.bf16 %v1085_v45, %v1084_v5 }
 0x38b   : > { %v1054_v30 = vmul.f32 %v2404_v20, %v993_v49  ;;  %v994_v23 = vadd.f32 %v1381_v12, %v2401_v44  ;;  %1422 = vmatpush3.bf16.msra.mxu1 %v1099_v27 }
 0x38c   : > { %1423 = vmatprep.subr.bf16.mxu1 %v2548_v22 }
 0x38d   : > { %v1055_v37 = vmul.f32 %v2404_v20, %v994_v23  ;;  %v1382_v32 = vpop.f32.mrb[16].mxu1  ;;  %v1086_v33 = vmul.f32 %v1070_v26, %v1054_v30  ;;  %v1078_v23 = vld [vmem:[#allocation10 + $0x70] sm:$0xff]  ;;  %v1079_v26 = vld [vmem:[#allocation10 + $0x78] sm:$0xff] }
 0x38e   : > { %v1383_v40 = vpop.f32.mrb[17].mxu1 }
 0x38f   : > { %v1087_v43 = vmul.f32 %v1071_v31, %v1055_v37  ;;  %v1384_v46 = vadd.f32 %v1383_v40, %v1382_v32  ;;  %v1385_v50 = vpop.f32.mrb[18].mxu1 }
 0x390   : > { %v1386_v63 = vpop.f32.mrb[19].mxu1 }
 0x391   : > { %v995_v61 = vadd.f32 %v1384_v46, %v2401_v44  ;;  %v1387_v48 = vadd.f32 %v1386_v63, %v1385_v50  ;;  %v1100_v36 = vpack.c.bf16 %v1087_v43, %v1086_v33  ;;  %v1096_v33 = vld [vmem:[%s2513_s3] sm:$0xf] }
 0x393   : > { %v1056_v57 = vmul.f32 %v2404_v20, %v995_v61  ;;  %v996_v60 = vadd.f32 %v1387_v48, %v2401_v44  ;;  %1424 = vmatpush3.bf16.msra.mxu1 %v1100_v36 }
 0x394   : > { %1425 = vmatprep.subr.bf16.mxu1 %v2548_v22 }
 0x395   : > { %v1057_v8 = vmul.f32 %v2404_v20, %v996_v60  ;;  %v1388_v28 = vpop.f32.mrb[20].mxu1  ;;  %v1088_v7 = vmul.f32 %v1072_v0, %v1056_v57 }
 0x396   : > { %v1389_v39 = vpop.f32.mrb[21].mxu1 }
 0x397   : > { %v1089_v10 = vmul.f32 %v1073_v58, %v1057_v8  ;;  %v1390_v19 = vadd.f32 %v1389_v39, %v1388_v28  ;;  %v1391_v15 = vpop.f32.mrb[22].mxu1 }
 0x398   : > { %v1392_v17 = vpop.f32.mrb[23].mxu1 }
 0x399   : > { %v997_v52 = vadd.f32 %v1390_v19, %v2401_v44  ;;  %v1393_v16 = vadd.f32 %v1392_v17, %v1391_v15  ;;  %v1101_v53 = vpack.c.bf16 %v1089_v10, %v1088_v7 }
 0x39b   : > { %v1058_v55 = vmul.f32 %v2404_v20, %v997_v52  ;;  %v998_v25 = vadd.f32 %v1393_v16, %v2401_v44  ;;  %1426 = vmatpush3.bf16.msra.mxu1 %v1101_v53 }
 0x39c   : > { %1427 = vmatprep.subr.bf16.mxu1 %v2548_v22 }
 0x39d   : > { %v1059_v1 = vmul.f32 %v2404_v20, %v998_v25  ;;  %v1394_v13 = vpop.f32.mrb[24].mxu1  ;;  %v1090_v11 = vmul.f32 %v1074_v54, %v1058_v55 }
 0x39e   : > { %v1395_v4 = vpop.f32.mrb[25].mxu1 }
 0x39f   : > { %v1091_v3 = vmul.f32 %v1075_v18, %v1059_v1  ;;  %v1396_v35 = vadd.f32 %v1395_v4, %v1394_v13  ;;  %v1397_v42 = vpop.f32.mrb[26].mxu1 }
 0x3a0   : > { %v1398_v24 = vpop.f32.mrb[27].mxu1 }
 0x3a1   : > { %v999_v6 = vadd.f32 %v1396_v35, %v2401_v44  ;;  %v1399_v14 = vadd.f32 %v1398_v24, %v1397_v42  ;;  %v1102_v29 = vpack.c.bf16 %v1091_v3, %v1090_v11 }
 0x3a3   : > { %v1060_v34 = vmul.f32 %v2404_v20, %v999_v6  ;;  %v1000_v47 = vadd.f32 %v1399_v14, %v2401_v44  ;;  %1428 = vmatpush3.bf16.msra.mxu1 %v1102_v29 }
 0x3a4   : > { %1429 = vmatprep.subr.bf16.mxu1 %v2548_v22 }
 0x3a5   : > { %v1061_v21 = vmul.f32 %v2404_v20, %v1000_v47  ;;  %v1400_v38 = vpop.f32.mrb[28].mxu1  ;;  %v1092_v2 = vmul.f32 %v1076_v41, %v1060_v34 }
 0x3a6   : > { %v1401_v59 = vpop.f32.mrb[29].mxu1 }
 0x3a7   : > { %v1093_v5 = vmul.f32 %v1077_v51, %v1061_v21  ;;  %v1402_v45 = vadd.f32 %v1401_v59, %v1400_v38  ;;  %v1403_v56 = vpop.f32.mrb[30].mxu1 }
 0x3a8   : > { %v1404_v62 = vpop.f32.mrb[31].mxu1 }
 0x3a9   : > { %v1001_v9 = vadd.f32 %v1402_v45, %v2401_v44  ;;  %v1405_v49 = vadd.f32 %v1404_v62, %v1403_v56  ;;  %v1103_v12 = vpack.c.bf16 %v1093_v5, %v1092_v2 }
 0x3ab   : > { %v1062_v27 = vmul.f32 %v2404_v20, %v1001_v9  ;;  %v1002_v30 = vadd.f32 %v1405_v49, %v2401_v44  ;;  %1430 = vmatpush3.bf16.msra.mxu1 %v1103_v12  ;;  %v1146_v44 = vld [vmem:[%s2512_s2] sm:$0xf] }
 0x3ac   : > { %1431 = vmatprep.subr.bf16.mxu1 %v2548_v22 }
 0x3ad   : > { %v1063_v31 = vmul.f32 %v2404_v20, %v1002_v30  ;;  %v1094_v37 = vmul.f32 %v1078_v23, %v1062_v27 }
 0x3af   : > { %v1095_v32 = vmul.f32 %v1079_v26, %v1063_v31 }
 0x3b1   : > { %v1104_v40 = vpack.c.bf16 %v1095_v32, %v1094_v37 }
 0x3b3   : > { %1432 = vmatpush3.bf16.msra.mxu1 %v1104_v40 }
 0x3b4   : > { %1437 = vmatprep.subr.bf16.mxu1 %v2548_v22 }
 0x3b6   : > { %1434 = vmatmul.mubr.bf16.vlgmr.msra.gmra.mrb[32].mxu1 %v1096_v33 }
 0x3b7   : > { %1439 = vmatprep.mubr.msk.bf16.mxu1 %vm1786_vm2, %v2548_v22 }
 0x3bc   : > { %1438 = vmatpush3.bf16.xpose.msra.mxu1 %v1146_v44 }
 0x489   : > { %v1139_v20 = vpop.f32.mrb[32].mxu1 }
 0x48a   : > { %v1145_v43 = vpack.c.bf16 %v1139_v20, %v1139_v20  ;;  %v1435_v46 = vpop.f32.mrb[33].mxu1 }
 0x48b   : > { %v1142_v50 = vpop.f32.mrb[34].mxu1 }
 0x48c   : > { %v1436_v63 = vpop.f32.mrb[35].mxu1  ;;  %1440 = vmatmul.mubr.bf16.vlgmr.msra.gmra.mrb[36].mxu1 %v1145_v43 }
 0x55f   : > { %v1181_v22 = vpop.f32.mrb[36].mxu1 }
 0x560   : > { %1187 = vst.msk [vmem:[%s283_s25] sm:$0xff] %vm354_vm1, %v1181_v22  ;;  %v1441_v61 = vpop.f32.mrb[37].mxu1 }
 0x561   : > { %v1184_v48 = vpop.f32.mrb[38].mxu1 }
 0x562   : > { %1703 = shalt.err (!%p1700_p5)
}
 0x563   : > { %s1704_s11 = scalar_lea.hbm %s2460_s10, 128  ;;  %s1708_s30 = scalar_lea.hbm %s2515_s5, 256 }
 0x564   : > { %p1705_p10 = scmp.ne.s32.totalorder %s2460_s10, %s1704_s11  ;;  %p1709_p7 = scmp.lt.u32.totalorder %s2460_s10, %s2515_s5 }
 0x565   : > { %p1710_p3 = scmp.lt.u32.totalorder %s1708_s30, %s1704_s11  ;;  %p1712_p1 = scmp.lt.u32.totalorder %s1704_s11, %s2460_s10 }
 0x566   : > { %p1706_p13 = pnand %p1705_p10, %p1944_p8 }
 0x567   : > { %p1711_p11 = por %p1710_p3, %p1709_p7 }
 0x568   : > { %p1707_p9 = pneg %p1706_p13 }
 0x569   : > { %p1713_p4 = por %p1712_p1, %p1711_p11 }
 0x56b   : > { %p1714_p2 = pnand %p1713_p4, %p1707_p9 }
 0x56d   : > { %1717 = shalt.err (!%p1714_p2)
}
 0x56e   : > { %1453 = dma.vmem_to_hbm [thread:$0]  (%p1944_p8), %s2462_s6, 128, %s2460_s10, %s1189_s9   ;;  %v1442_v36 = vpop.f32.mrb[39].mxu1 }
 0x56f PF: > { %s1214_s25 = sand.u32 1, %s1756_s18   ;;  %p2549_p6 = scmp.ne.s32.totalorder %s2527_s29, 0 }
 0x570   : > { %p2550_p12 = scmp.ge.s32.totalorder %s1776_s23, 2  ;;  %s1215_s13 = scalar_lea.sflag [#allocation7], %s1214_s25 }
 0x572   : > { %p1467_p0 = pnand %p2550_p12, %p2549_p6 }
 0x574   : > { %1751 = dma.done.wait (!%p1467_p0), %s1215_s13, 128  }
 0x575   : > { %1753 = vsyncadd (!%p1467_p0), %s1215_s13, 4294967168  ;;  %s22_s23 = sadd.s32 1, %s1776_s23   ;;  %s2551_s18 = smov %s1760_s19 }
 0x576   : > { %p19_p5 = scmp.ge.s32.totalorder %s22_s23, 4   ;;  %s2552_s19 = smov %s1764_s20 }
 0x577   : > { %s2553_s20 = smov %s1953_s15  ;;  %s2554_s21 = smov %s1772_s22 }
 0x578   : > { %s2555_s22 = smov %s2557_s8  ;;  %21 = sbr.rel (!%p19_p5) target bundleno = 7 (0x7), region = 101 }
 0x57f   :  { %1220 = vsyncpa [#allocation6], 1 }
 0x580   :  { %1222 = vsyncpa [#allocation6 + $0x1], 1 }
 0x581   :  { %1223 = vsyncpa [#allocation9], 1 }
 0x582   :  { %1224 = vsyncpa [#allocation7], 1 }
 0x583   :  { %1226 = vsyncpa [#allocation7 + $0x1], 1 }

</bundles_post_ra>
